<compile_context>
chip_gen: v6e
topology: v6e:2x2x1
jax: 0.10.0
libtpu: 0.0.40
codegen_flags: <defaults>
</compile_context>

<pallas_src>
import functools
import math

import jax
import jax.numpy as jnp
import numpy as np
from jax.experimental import pallas as pl
from jax.experimental.pallas import tpu as pltpu


# ---------------------------------------------------------------------------
# Parameter / buffer construction (deterministic, plain JAX "glue")
# ---------------------------------------------------------------------------
def _round_up(n, m):
    return ((n + m - 1) // m) * m


def sinusoidal_table(n, d_model):
    """Same math as PositionalEmbedding / FixedEmbedding sinusoidal buffers."""
    pos = jnp.arange(n, dtype=jnp.float32)[:, None]
    div = jnp.exp(
        jnp.arange(0, d_model, 2, dtype=jnp.float32) * -(math.log(10000.0) / d_model)
    )
    tbl = jnp.zeros((n, d_model), dtype=jnp.float32)
    tbl = tbl.at[:, 0::2].set(jnp.sin(pos * div))
    tbl = tbl.at[:, 1::2].set(jnp.cos(pos * div))
    return tbl


def make_token_conv_weight(key, c_in, d_model):
    """Conv1d(c_in, d_model, k=3, bias=False), kaiming_normal fan_in / leaky_relu."""
    fan_in = c_in * 3
    std = math.sqrt(2.0) / math.sqrt(fan_in)
    w = jax.random.normal(key, (d_model, c_in, 3), dtype=jnp.float32) * std
    # Flatten to (3*c_in, d_model): row index = k * c_in + c  (k=0 <-> x[l-1]).
    w_flat = jnp.transpose(w, (2, 1, 0)).reshape(3 * c_in, d_model)
    return w, w_flat


# Fixed temporal tables concatenated: [month(13), day(32), weekday(7), hour(24)]
TEMP_SIZES = (13, 32, 7, 24)       # x_mark columns: 0=month, 1=day, 2=weekday, 3=hour
TEMP_OFFSETS = (0, 13, 45, 52)
TEMP_TOTAL = sum(TEMP_SIZES)       # 76
K_ONEHOT = _round_up(TEMP_TOTAL, 8)  # 80 (lane-aligned segment, extra cols never hit)


def make_temporal_table(d_model):
    return jnp.concatenate([sinusoidal_table(n, d_model) for n in TEMP_SIZES], axis=0)


def make_fused_weight(w_flat, t_table, k_x):
    """Rows: [conv taps (3*c_in) ; zeros -> k_x ; temporal tables (76) ; zeros -> 80]."""
    c3, d_model = w_flat.shape
    w = jnp.concatenate(
        [
            w_flat,
            jnp.zeros((k_x - c3, d_model), jnp.float32),
            t_table,
            jnp.zeros((K_ONEHOT - TEMP_TOTAL, d_model), jnp.float32),
        ],
        axis=0,
    )
    return w.astype(jnp.bfloat16)


# ---------------------------------------------------------------------------
# Pallas kernel: fused [shifted-x | multihot] @ [w_conv ; t_table] + pe
# ---------------------------------------------------------------------------
def data_embedding_kernel(x_ref, mark_ref, w_ref, pe_ref, out_ref, *, k_x, k_one):
    # x_ref:    (bb, L, c_in)       f32    raw series values
    # mark_ref: (bb, L, 4)          int32  temporal indices [month, day, weekday, hour]
    # w_ref:    (k_x + k_one, d)    bf16   fused [conv taps ; temporal tables]
    # pe_ref:   (L, d)              f32    positional embedding
    # out_ref:  (bb, L, d)
    bb, seq, c_in = x_ref.shape
    d = w_ref.shape[1]
    k_fused = k_x + k_one

    # --- token part: circular +/-1 shifts along L via XLU sublane rotates. ---
    x = x_ref[...]                                        # (bb, L, c) f32 (tiny)
    x_prev = pltpu.roll(x, 1, axis=1)                     # x_prev[l] = x[(l-1) % L]
    x_next = pltpu.roll(x, seq - 1, axis=1)               # x_next[l] = x[(l+1) % L]
    xg = jnp.concatenate([x_prev, x, x_next], axis=-1).astype(jnp.bfloat16)
    if k_x > 3 * c_in:                                    # lane-align the x group
        xg = jnp.concatenate(
            [xg, jnp.zeros((bb, seq, k_x - 3 * c_in), jnp.bfloat16)], axis=-1)

    # --- temporal part: multi-hot indicator over the concatenated fixed tables.
    # Compares stay in int32 (v5e has no bf16 VALU); one select + one cast at the end.
    marks = mark_ref[...]                                 # (bb, L, 4) int32
    iota = jax.lax.broadcasted_iota(jnp.int32, (bb, seq, k_one), 2)
    hit = iota == (marks[:, :, 0:1] + TEMP_OFFSETS[0])
    for i in range(1, len(TEMP_OFFSETS)):
        hit = hit | (iota == (marks[:, :, i:i + 1] + TEMP_OFFSETS[i]))
    onehot = jnp.where(hit, 1.0, 0.0).astype(jnp.bfloat16)  # (bb, L, k_one) bf16

    # --- one fused MXU contraction + f32 positional bias. ---
    a = jnp.concatenate([xg, onehot], axis=-1)             # (bb, L, K) bf16
    a2 = a.reshape(bb * seq, k_fused)
    acc = jnp.dot(a2, w_ref[...], preferred_element_type=jnp.float32)
    res = acc.reshape(bb, seq, d) + pe_ref[...][None, :, :]
    out_ref[...] = res.astype(out_ref.dtype)


# ---------------------------------------------------------------------------
# Wrapper: batch-block selection + pallas_call
# ---------------------------------------------------------------------------
VMEM_BUDGET_BYTES = 24 * 1024 * 1024   # conservative per-step budget (v7x: 64 MiB phys)
VMEM_LIMIT_BYTES = 48 * 1024 * 1024    # explicit scoped-VMEM limit (< v7x physical)


def _pick_batch_block(B, L, c_in, k_fused, d_model, out_bytes):
    """Largest bb dividing B with bb*L >= ~2048 MXU rows when possible, grid >= 2
    when B > 1 (v7x megacore sharding), and an estimated per-step VMEM footprint
    under VMEM_BUDGET_BYTES.  Note: a prime B falls back to bb=1 (perf cliff only,
    still correct)."""

    def vmem_bytes(bb):
        rows = bb * L
        return (2 * rows * c_in * 4                 # x block (double-buffered)
                + 2 * rows * 4 * 4                  # x_mark block
                + 2 * k_fused * d_model * 2         # fused weight (charged as 2 bufs)
                + 2 * L * d_model * 4               # pe (charged as 2 bufs)
                + 2 * rows * d_model * out_bytes    # output block
                + rows * (2 * k_fused * 2 + 2 * d_model * 4))  # in-kernel temps

    cap = max(1, B // 2) if B > 1 else 1            # keep >= 2 grid steps when possible
    target = max(1, min(cap, (2048 + L - 1) // L))  # >= ~2048 MXU rows per step
    for cand in range(min(B, target), 0, -1):
        if B % cand == 0 and vmem_bytes(cand) <= VMEM_BUDGET_BYTES:
            return cand
    return 1


def data_embedding_forward(x, x_mark, w_fused, pe, *, k_x, out_dtype=jnp.float32):
    """x: (B, L, c_in) f32, x_mark: (B, L, 4) int32,
    w_fused: (k_x + 80, d_model) bf16, pe: (L, d_model) f32."""
    B, L, c_in = x.shape
    k_fused, d_model = w_fused.shape
    k_one = k_fused - k_x
    out_bytes = jnp.dtype(out_dtype).itemsize

    bb = _pick_batch_block(B, L, c_in, k_fused, d_model, out_bytes)
    grid = (B // bb,)

    flops = 2 * B * L * k_fused * d_model
    bytes_accessed = (B * L * c_in * 4            # x, f32
                      + B * L * 4 * 4             # x_mark, int32
                      + k_fused * d_model * 2     # fused weight (resident)
                      + L * d_model * 4           # pe (resident)
                      + B * L * d_model * out_bytes)

    kernel = functools.partial(data_embedding_kernel, k_x=k_x, k_one=k_one)
    return pl.pallas_call(
        kernel,
        out_shape=jax.ShapeDtypeStruct((B, L, d_model), out_dtype),
        grid=grid,
        in_specs=[
            pl.BlockSpec((bb, L, c_in), lambda b: (b, 0, 0)),
            pl.BlockSpec((bb, L, 4), lambda b: (b, 0, 0)),
            # Constant block index -> VMEM-resident across grid steps.
            pl.BlockSpec((k_fused, d_model), lambda b: (0, 0)),
            pl.BlockSpec((L, d_model), lambda b: (0, 0)),
        ],
        out_specs=pl.BlockSpec((bb, L, d_model), lambda b: (b, 0, 0)),
        compiler_params=pltpu.CompilerParams(
            dimension_semantics=("parallel",),
            vmem_limit_bytes=VMEM_LIMIT_BYTES),
        cost_estimate=pl.CostEstimate(
            flops=flops, transcendentals=0, bytes_accessed=bytes_accessed),
    )(x, x_mark, w_fused, pe)


# ---------------------------------------------------------------------------
# Pure-JAX references (mirror the PyTorch forward).
#   quantize_bf16=True  -> matmul operands rounded to bf16 (matches the kernel's
#                          MXU inputs exactly; tight tolerance check).
#   quantize_bf16=False -> true f32 forward (loose tolerance, bounds bf16 error).
# ---------------------------------------------------------------------------
def reference_forward(x, x_mark, w_conv, t_table, pe, *, quantize_bf16=True):
    q = (lambda a: a.astype(jnp.bfloat16).astype(jnp.float32)) if quantize_bf16 \
        else (lambda a: a)
    xq, wq, tq = q(x), q(w_conv), q(t_table)
    B, L, c_in = x.shape
    # circular conv1d, k=3, pad=1, bias=False
    xp = jnp.concatenate([xq[:, -1:, :], xq, xq[:, :1, :]], axis=1)  # (B, L+2, c)
    tok = jnp.zeros((B, L, w_conv.shape[0]), jnp.float32)
    for k in range(3):
        tok = tok + jnp.einsum("blc,oc->blo", xp[:, k:k + L, :], wq[:, :, k],
                               precision=jax.lax.Precision.HIGHEST)
    # fixed temporal embedding: sum of 4 table rows per token
    temporal = jnp.zeros((B, L, t_table.shape[1]), jnp.float32)
    for i, off in enumerate(TEMP_OFFSETS):
        temporal = temporal + tq[x_mark[:, :, i] + off]
    return tok + temporal + pe[None, :, :]


# ---------------------------------------------------------------------------
# Demo / self-check
# ---------------------------------------------------------------------------
def _run_case(B, L, c_in, d_model, seed):
    key = jax.random.PRNGKey(seed)
    kw, kx, km = jax.random.split(key, 3)

    w_conv, w_flat = make_token_conv_weight(kw, c_in, d_model)
    t_table = make_temporal_table(d_model)
    pe = sinusoidal_table(L, d_model)              # PositionalEmbedding pe[:, :L]
    k_x = _round_up(3 * c_in, 8)
    w_fused = make_fused_weight(w_flat, t_table, k_x)

    x = jax.random.normal(kx, (B, L, c_in), dtype=jnp.float32)
    kms = jax.random.split(km, 4)
    # x_mark columns: [month(<13), day(<32), weekday(<7), hour(<24)]  (freq='h')
    x_mark = jnp.stack(
        [
            jax.random.randint(kms[0], (B, L), 0, 13),
            jax.random.randint(kms[1], (B, L), 0, 32),
            jax.random.randint(kms[2], (B, L), 0, 7),
            jax.random.randint(kms[3], (B, L), 0, 24),
        ],
        axis=-1,
    ).astype(jnp.int32)

    out = data_embedding_forward(x, x_mark, w_fused, pe, k_x=k_x)
    out = jax.block_until_ready(out)

    # Tight check vs. a reference with the same bf16 operand quantization.
    ref_q = reference_forward(x, x_mark, w_conv, t_table, pe, quantize_bf16=True)
    np.testing.assert_allclose(np.asarray(out), np.asarray(ref_q),
                               rtol=1e-4, atol=1e-4)
    # Loose check vs. the true f32 forward (bounds the bf16-operand deviation).
    ref_f = reference_forward(x, x_mark, w_conv, t_table, pe, quantize_bf16=False)
    np.testing.assert_allclose(np.asarray(out), np.asarray(ref_f),
                               rtol=1e-1, atol=1e-1)


if __name__ == "__main__":
    # Small shapes consistent with the module (batch=2, channels=4, seq=16, hidden=32).
    _run_case(B=2, L=16, c_in=4, d_model=32, seed=0)
    # Slightly larger case exercising bb > 1, grid = 2 (megacore) and the K_X pad path.
    _run_case(B=8, L=32, c_in=7, d_model=64, seed=0)
    print("KERNEL_OK")
</pallas_src>

<mosaic_0001>
module attributes {stable_mosaic.version = 11 : i64} {
  func.func @data_embedding_kernel(%arg0: i32, %arg1: memref<1x16x4xf32, #tpu.memory_space<vmem>>, %arg2: memref<1x16x4xi32, #tpu.memory_space<vmem>>, %arg3: memref<96x32xbf16, #tpu.memory_space<vmem>>, %arg4: memref<16x32xf32, #tpu.memory_space<vmem>>, %arg5: memref<1x16x32xf32, #tpu.memory_space<vmem>>) attributes {dimension_semantics = [#tpu.dimension_semantics<parallel>], iteration_bounds = array<i64: 2>, scalar_prefetch = 0 : i64, scratch_operands = 0 : i64, tpu.core_type = #tpu.core_type<tc>, window_params = [{transform_indices = @transform_0, window_bounds = array<i64: 1, 16, 4>}, {transform_indices = @transform_1, window_bounds = array<i64: 1, 16, 4>}, {pipeline_mode = #tpu.pipeline_mode<synchronous>, transform_indices = @transform_2, window_bounds = array<i64: 96, 32>}, {pipeline_mode = #tpu.pipeline_mode<synchronous>, transform_indices = @transform_3, window_bounds = array<i64: 16, 32>}, {transform_indices = @transform_4, window_bounds = array<i64: 1, 16, 32>}]} {
    %c0 = arith.constant 0 : index
    %c0_0 = arith.constant 0 : index
    %c0_1 = arith.constant 0 : index
    %0 = vector.load %arg1[%c0, %c0_0, %c0_1] : memref<1x16x4xf32, #tpu.memory_space<vmem>>, vector<1x16x4xf32>
    %c1_i32 = arith.constant 1 : i32
    %1 = tpu.dynamic_rotate %0 by %c1_i32 dim 1 : vector<1x16x4xf32>, i32 -> vector<1x16x4xf32>
    %c15_i32 = arith.constant 15 : i32
    %2 = tpu.dynamic_rotate %0 by %c15_i32 dim 1 : vector<1x16x4xf32>, i32 -> vector<1x16x4xf32>
    %3 = tpu.concatenate %1, %0, %2 in 2 : vector<1x16x4xf32>, vector<1x16x4xf32>, vector<1x16x4xf32> -> vector<1x16x12xf32>
    %4 = arith.truncf %3 : vector<1x16x12xf32> to vector<1x16x12xbf16>
    %cst = arith.constant 0.000000e+00 : bf16
    %5 = vector.broadcast %cst : bf16 to vector<1x16x4xbf16>
    %6 = tpu.concatenate %4, %5 in 2 : vector<1x16x12xbf16>, vector<1x16x4xbf16> -> vector<1x16x16xbf16>
    %c0_2 = arith.constant 0 : index
    %c0_3 = arith.constant 0 : index
    %c0_4 = arith.constant 0 : index
    %7 = vector.load %arg2[%c0_2, %c0_3, %c0_4] : memref<1x16x4xi32, #tpu.memory_space<vmem>>, vector<1x16x4xi32>
    %8 = tpu.iota {dimensions = array<i32: 2>} : vector<1x16x80xi32>
    %9 = vector.extract_strided_slice %7 {offsets = [0, 0, 0], sizes = [1, 16, 1], strides = [1, 1, 1]} : vector<1x16x4xi32> to vector<1x16x1xi32>
    %c0_i32 = arith.constant 0 : i32
    %10 = vector.broadcast %c0_i32 : i32 to vector<1x16x1xi32>
    %11 = arith.addi %9, %10 : vector<1x16x1xi32>
    %12 = vector.broadcast %11 : vector<1x16x1xi32> to vector<1x16x80xi32>
    %13 = arith.cmpi eq, %8, %12 : vector<1x16x80xi32>
    %14 = vector.extract_strided_slice %7 {offsets = [0, 0, 1], sizes = [1, 16, 1], strides = [1, 1, 1]} : vector<1x16x4xi32> to vector<1x16x1xi32>
    %c13_i32 = arith.constant 13 : i32
    %15 = vector.broadcast %c13_i32 : i32 to vector<1x16x1xi32>
    %16 = arith.addi %14, %15 : vector<1x16x1xi32>
    %17 = vector.broadcast %16 : vector<1x16x1xi32> to vector<1x16x80xi32>
    %18 = arith.cmpi eq, %8, %17 : vector<1x16x80xi32>
    %19 = arith.ori %13, %18 : vector<1x16x80xi1>
    %20 = vector.extract_strided_slice %7 {offsets = [0, 0, 2], sizes = [1, 16, 1], strides = [1, 1, 1]} : vector<1x16x4xi32> to vector<1x16x1xi32>
    %c45_i32 = arith.constant 45 : i32
    %21 = vector.broadcast %c45_i32 : i32 to vector<1x16x1xi32>
    %22 = arith.addi %20, %21 : vector<1x16x1xi32>
    %23 = vector.broadcast %22 : vector<1x16x1xi32> to vector<1x16x80xi32>
    %24 = arith.cmpi eq, %8, %23 : vector<1x16x80xi32>
    %25 = arith.ori %19, %24 : vector<1x16x80xi1>
    %26 = vector.extract_strided_slice %7 {offsets = [0, 0, 3], sizes = [1, 16, 1], strides = [1, 1, 1]} : vector<1x16x4xi32> to vector<1x16x1xi32>
    %c52_i32 = arith.constant 52 : i32
    %27 = vector.broadcast %c52_i32 : i32 to vector<1x16x1xi32>
    %28 = arith.addi %26, %27 : vector<1x16x1xi32>
    %29 = vector.broadcast %28 : vector<1x16x1xi32> to vector<1x16x80xi32>
    %30 = arith.cmpi eq, %8, %29 : vector<1x16x80xi32>
    %31 = arith.ori %25, %30 : vector<1x16x80xi1>
    %cst_5 = arith.constant 1.000000e+00 : f32
    %cst_6 = arith.constant 0.000000e+00 : f32
    %32 = vector.broadcast %cst_5 : f32 to vector<1x16x80xf32>
    %33 = vector.broadcast %cst_6 : f32 to vector<1x16x80xf32>
    %34 = arith.select %31, %32, %33 : vector<1x16x80xi1>, vector<1x16x80xf32>
    %35 = arith.truncf %34 : vector<1x16x80xf32> to vector<1x16x80xbf16>
    %36 = tpu.concatenate %6, %35 in 2 : vector<1x16x16xbf16>, vector<1x16x80xbf16> -> vector<1x16x96xbf16>
    %37 = vector.shape_cast %36 : vector<1x16x96xbf16> to vector<16x96xbf16>
    %c0_7 = arith.constant 0 : index
    %c0_8 = arith.constant 0 : index
    %38 = vector.load %arg3[%c0_7, %c0_8] : memref<96x32xbf16, #tpu.memory_space<vmem>>, vector<96x32xbf16>
    %cst_9 = arith.constant dense<0.000000e+00> : vector<16x32xf32>
    %39 = tpu.matmul %37, %38, %cst_9 {dimension_numbers = #tpu.dot_dimension_numbers<[1], [0], [0], [1], [0, 0, 1, 1], [], []>} : vector<16x96xbf16>, vector<96x32xbf16>, vector<16x32xf32> -> vector<16x32xf32>
    %40 = vector.shape_cast %39 : vector<16x32xf32> to vector<1x16x32xf32>
    %c0_10 = arith.constant 0 : index
    %c0_11 = arith.constant 0 : index
    %41 = vector.load %arg4[%c0_10, %c0_11] : memref<16x32xf32, #tpu.memory_space<vmem>>, vector<16x32xf32>
    %42 = vector.shape_cast %41 : vector<16x32xf32> to vector<1x16x32xf32>
    %43 = arith.addf %40, %42 : vector<1x16x32xf32>
    %c0_12 = arith.constant 0 : index
    %c0_13 = arith.constant 0 : index
    %c0_14 = arith.constant 0 : index
    %44 = vector.load %arg5[%c0_12, %c0_13, %c0_14] : memref<1x16x32xf32, #tpu.memory_space<vmem>>, vector<1x16x32xf32>
    tpu.vector_store %arg5[%c0_12, %c0_13, %c0_14], %43 {strides = array<i32>} : memref<1x16x32xf32, #tpu.memory_space<vmem>>, vector<1x16x32xf32>,
    return
  }
  func.func @transform_0(%arg0: i32) -> (i32, i32, i32) {
    %c0_i32 = arith.constant 0 : i32
    %c0_i32_0 = arith.constant 0 : i32
    %c0_i32_1 = arith.constant 0 : i32
    return %arg0, %c0_i32, %c0_i32_0 : i32, i32, i32
  }
  func.func @transform_1(%arg0: i32) -> (i32, i32, i32) {
    %c0_i32 = arith.constant 0 : i32
    %c0_i32_0 = arith.constant 0 : i32
    %c0_i32_1 = arith.constant 0 : i32
    return %arg0, %c0_i32, %c0_i32_0 : i32, i32, i32
  }
  func.func @transform_2(%arg0: i32) -> (i32, i32) {
    %c0_i32 = arith.constant 0 : i32
    %c0_i32_0 = arith.constant 0 : i32
    %c0_i32_1 = arith.constant 0 : i32
    return %c0_i32, %c0_i32_0 : i32, i32
  }
  func.func @transform_3(%arg0: i32) -> (i32, i32) {
    %c0_i32 = arith.constant 0 : i32
    %c0_i32_0 = arith.constant 0 : i32
    %c0_i32_1 = arith.constant 0 : i32
    return %c0_i32, %c0_i32_0 : i32, i32
  }
  func.func @transform_4(%arg0: i32) -> (i32, i32, i32) {
    %c0_i32 = arith.constant 0 : i32
    %c0_i32_0 = arith.constant 0 : i32
    %c0_i32_1 = arith.constant 0 : i32
    return %arg0, %c0_i32, %c0_i32_0 : i32, i32, i32
  }
}

</mosaic_0001>

<bundles_post_ra>
// kernel: tpu_custom_call.1
= control target key start
LH: loop header
LB: loop body
LE: loop exit
PB: predicated region body
PF: predicated region fallthrough
CT: control target
= control target key end

     0   :  { %9 = vsyncpa [#allocation3], 0  ;;  %s858_s0 = inlined_call_operand.vmem [shape: f32[2,16,4], index: 0, kind: input, shape index: {}]   ;;  %s859_s1 = inlined_call_operand.vmem [shape: s32[2,16,4], index: 1, kind: input, shape index: {}]   ;;  %s860_s2 = inlined_call_operand.vmem [shape: bf16[96,32], index: 2, kind: input, shape index: {}]   ;;  %s861_s3 = inlined_call_operand.vmem [shape: f32[16,32], index: 3, kind: input, shape index: {}]   ;;  %s862_s4 = inlined_call_operand.hbm [shape: f32[2,16,32], index: 4, kind: output, shape index: {}]  }
   0x1   :  { %11 = vsyncpa [#allocation3 + $0x1], 0  ;;  %s718_s15 = smov 0   ;;  %s720_s16 = smov 0  }
   0x2   :  { %s722_s17 = smov 0   ;;  %s724_s18 = smov 0  }
   0x3 LB: > { %s739_s19 = sadd.s32 4294967295, %s680_s18   ;;  %s502_s20 = sadd.s32 4294967294, %s680_s18   ;;  %s680_s18 = sphi %s724_s18, %s868_s18   ;;  %s676_s17 = sphi %s722_s17, %s867_s17   ;;  %s672_s16 = sphi %s720_s16, %s866_s16   ;;  %s668_s15 = sphi %s718_s15, %s865_s15  }
   0x4   : > { %s743_s21 = sadd.s32 1, %s680_s18   ;;  %s118_s22 = sadd.s32 1, %s676_s17 }
   0x5   : > { %s115_s23 = ssub.s32 %s680_s18, %s743_s21  ;;  %p128_p0 = scmp.ne.s32.totalorder %s676_s17, %s672_s16 }
   0x6   : > { %p116_p1 = scmp.eq.s32.totalorder %s115_s23, 0  ;;  %p129_p2 = scmp.eq.s32.totalorder %s739_s19, 1 }
   0x7   : > { %p134_p3 = scmp.ne.s32.totalorder %s672_s16, %s668_s15  ;;  %p135_p4 = scmp.eq.s32.totalorder %s502_s20, 1 }
   0x8   : > { %s754_s24 = scalar_select %p116_p1, %s676_s17, %s118_s22  }
   0x9   : > { %p756_p5 = por %p129_p2, %p128_p0  ;;  %p760_p6 = por %p135_p4, %p134_p3 }
   0xa   : > { %p505_p7 = scmp.ge.s32.totalorder %s680_s18, 1  ;;  %p175_p8 = scmp.lt.s32.totalorder %s680_s18, 3 }
   0xc   : > { %p176_p9 = pnand %p505_p7, %p175_p8 }
   0xd   : > { %p206_p10 = scmp.lt.s32.totalorder (!%p176_p9), %s739_s19, 1  ;;  %s687_s13 = smov (!%p176_p9), 4  }
   0xe   : > { %179 = sbr.rel (%p176_p9) target bundleno = 498 (0x1f2), region = 36  ;;  %s688_s22 = smov (!%p176_p9), 8  }
   0xf   : > { %s690_s6 = smov (!%p176_p9), 16   ;;  %s203_s7 = sand.u32 (!%p176_p9), 1, %s672_s16  }
  0x10   : > { %s525_s20 = sshll.u32 (!%p176_p9), %s739_s19, 8  ;;  %s817_s29 = scalar_lea.sflag (!%p176_p9), [#allocation3], %s203_s7 }
  0x13   : > { %v682_v0 = vmov 0   ;;  %v683_v1 = vmov 1   ;;  %s207_s27 = scalar_select %p206_p10, %s739_s19, 1  ;;  %v684_v8 = vmov 2   ;;  %v221_v9 = vlaneseq  ;;  %v614_v24 = vld [vmem:[%s860_s2 + $0x28] sm:$0xff]   ;;  %v615_v27 = vld [vmem:[%s860_s2 + $0x20] sm:$0xff]  }
  0x14   : > { %598 = vset.pattern.permute.xlu0 %v682_v0  ;;  %599 = vset.pattern.permute.xlu1 %v683_v1  ;;  %v685_v10 = vmov 0.0   ;;  %v686_v16 = vmov 3   ;;  %v616_v29 = vld [vmem:[%s860_s2 + $0x18] sm:$0xff]   ;;  %v617_v30 = vld [vmem:[%s860_s2 + $0x10] sm:$0xff]   ;;  %v618_v31 = vld [vmem:[%s860_s2 + $0x8] sm:$0xff]   ;;  %vm689_vm2 = vmmov 0  }
  0x15   : > { %s523_s28 = sshll.u32 %s207_s27, 4  ;;  %533 = vmatprep.subr.bf16.mxu0 %v685_v10  ;;  %v222_v14 = vshrl.u32 %v221_v9, 7  ;;  %v619_v32 = vld [vmem:[%s860_s2] sm:$0xff]   ;;  %v261_v36 = vand.u32 127, %v221_v9  ;;  %545 = vmatprep.mubr.msk.bf16.mxu0 %vm689_vm2, %v685_v10  ;;  %vm250_vm2 = vcmask 64512   ;;  %v408_v63 = vld [vmem:[%s861_s3 + $0x8] sm:$0xff] }
  0x16   : > { %s215_s5 = scalar_lea.vmem %s859_s1, %s523_s28  ;;  %s210_s8 = scalar_lea.vmem %s858_s0, %s523_s28  ;;  %534 = vmatpush3.bf16.msra.mxu0 %v614_v24  ;;  %v407_v59 = vld [vmem:[%s861_s3] sm:$0xff] }
  0x17   : > { %v258_v2 = vld [vmem:[%s215_s5] sm:$0xff]  ;;  %v259_v3 = vld [vmem:[%s215_s5 + $0x8] sm:$0xff]  ;;  %vm228_vm0 = vcmp.lt.s32.totalorder %v222_v14, 7  ;;  %vm223_vm1 = vcmp.lt.s32.totalorder %v222_v14, 1  ;;  %535 = vmatprep.subr.bf16.mxu0 %v685_v10  ;;  %s815_s28 = scalar_lea.hbm %s862_s4, %s525_s20  ;;  %s691_s19 = smov [#allocation2]  }
  0x18   : > { %263 = vperm.xlu0 %598, %v258_v2   ;;  %v270_v4 = vadd.s32 13, %v258_v2  ;;  %v271_v5 = vadd.s32 13, %v259_v3  ;;  %v282_v6 = vadd.s32 45, %v258_v2  ;;  %v283_v7 = vadd.s32 45, %v259_v3  ;;  %v217_v12 = vld [vmem:[%s210_s8] sm:$0xff]  ;;  %v218_v13 = vld [vmem:[%s210_s8 + $0x8] sm:$0xff] }
  0x19   : > { %v295_v11 = vadd.s32 52, %v259_v3  ;;  %v294_v15 = vadd.s32 52, %v258_v2  ;;  %v227_v17 = vrot.slane %v218_v13, 1  ;;  %v226_v18 = vrot.slane %v217_v12, 1  ;;  %s506_s8 = sshll.u32 %s203_s7, 4  ;;  %s624_s5 = sshll.u32 %s691_s19, 4  ;;  %s625_s5 = int_to_ptr.vmem [resolvable:$false] %s624_s5 }
  0x1a   : > { %273 = vperm.xlu1 %599, %v270_v4   ;;  %v220_v19 = vrot.slane %v218_v13, 7  ;;  %v219_v20 = vrot.slane %v217_v12, 7  ;;  %v604_v21 = vpack.i.bf16 %v218_v13, %v217_v12  ;;  %536 = vmatpush3.bf16.msra.mxu0 %v615_v27  ;;  %s205_s11 = scalar_lea.vmem [#allocation2], %s506_s8 }
  0x1b   : > { %v229_v22 = vsel %vm228_vm0, %v226_v18, %v227_v17  ;;  %v230_v23 = vsel %vm228_vm0, %v227_v17, %v226_v18  ;;  %537 = vmatprep.subr.bf16.mxu0 %v685_v10  ;;  %s428_s12 = sshll.u32 %s205_s11, 4  ;;  %s810_s12 = int_to_ptr.vmem [resolvable:$true] %s428_s12 }
  0x1c   : > { %266 = vperm.xlu0 %598, %v259_v3   ;;  %v224_v25 = vsel %vm223_vm1, %v219_v20, %v220_v19  ;;  %v225_v26 = vsel %vm223_vm1, %v220_v19, %v219_v20  ;;  %v609_v28 = vpack.i.bf16 %v230_v23, %v229_v22  ;;  %vm247_vm1 = vcmask 31744   ;;  %s620_s30 = scalar_lea.vmem %s810_s12, 256  ;;  %p627_p0 = scmp.lt.s32.totalorder %s810_s12, %s625_s5 }
  0x1d   : > { %p621_p11 = scmp.ne.s32.totalorder %s810_s12, %s620_s30 }
  0x1e   : > { %276 = vperm.xlu1 %599, %v271_v5   ;;  %538 = vmatpush3.bf16.msra.mxu0 %v616_v29 }
  0x1f   : > { %539 = vmatprep.subr.bf16.mxu0 %v685_v10  ;;  %p622_p12 = pnand %p621_p11, %p756_p5 }
  0x20   : > { %600 = vset.pattern.permute.xlu0 %v684_v8 }
  0x21   : > { %285 = vperm.xlu0 %600, %v282_v6   ;;  %p623_p13 = pneg %p622_p12 }
  0x22   : > { %601 = vset.pattern.permute.xlu1 %v684_v8  ;;  %540 = vmatpush3.bf16.msra.mxu0 %v617_v30 }
  0x23   : > { %288 = vperm.xlu1 %601, %v283_v7   ;;  %541 = vmatprep.subr.bf16.mxu0 %v685_v10 }
  0x25   : > { %603 = vset.pattern.permute.xlu0 %v686_v16 }
  0x26   : > { %300 = vperm.xlu0 %603, %v295_v11   ;;  %542 = vmatpush3.bf16.msra.mxu0 %v618_v31 }
  0x27   : > { %602 = vset.pattern.permute.xlu1 %v686_v16  ;;  %543 = vmatprep.subr.bf16.mxu0 %v685_v10 }
  0x28   : > { %297 = vperm.xlu1 %602, %v294_v15  }
  0x2a   : > { %544 = vmatpush3.bf16.msra.mxu0 %v619_v32 }
  0x2c   : > { %605 = vrot.lane.b32.xlu1 %v604_v21, %s687_s13 }
  0x30   : > { %610 = vrot.lane.b32.xlu1 %v609_v28, %s688_s22 }
  0x93   : > { %v264_v33 = vpop.permute.xlu0 %263 }
  0x94   : > { %vm268_vm3 = vcmp.eq.s32.totalorder %v261_v36, %v264_v33 }
  0x95   : > { %v274_v34 = vpop.permute.xlu1 %273 }
  0x96   : > { %vm278_vm4 = vcmp.eq.s32.totalorder %v261_v36, %v274_v34 }
  0x97   : > { %v267_v35 = vpop.permute.xlu0 %266  ;;  %vm280_vm7 = vmor %vm268_vm3, %vm278_vm4  ;;  %vm254_vm3 = vcmask 97280   ;;  %vm312_vm4 = vcmask 130048  }
  0x98   : > { %vm269_vm8 = vcmp.eq.s32.totalorder %v261_v36, %v267_v35 }
  0x99   : > { %v277_v37 = vpop.permute.xlu1 %276 }
  0x9a   : > { %vm279_vm5 = vcmp.eq.s32.totalorder %v261_v36, %v277_v37 }
  0x9b   : > { %vm281_vm9 = vmor %vm269_vm8, %vm279_vm5  ;;  %vm363_vm5 = vcmask 785408  }
  0x9c   : > { %v286_v38 = vpop.permute.xlu0 %285 }
  0x9d   : > { %vm290_vm10 = vcmp.eq.s32.totalorder %v261_v36, %v286_v38 }
  0x9e   : > { %v289_v39 = vpop.permute.xlu1 %288  ;;  %vm292_vm14 = vmor %vm280_vm7, %vm290_vm10 }
  0x9f   : > { %vm291_vm6 = vcmp.eq.s32.totalorder %v261_v36, %v289_v39 }
  0xa0   : > { %vm293_vm11 = vmor %vm281_vm9, %vm291_vm6  ;;  %vm411_vm6 = vcmask 261120  }
  0xa1   : > { %v301_v40 = vpop.permute.xlu0 %300 }
  0xa2   : > { %vm303_vm12 = vcmp.eq.s32.totalorder %v261_v36, %v301_v40 }
  0xa3   : > { %vm305_vm13 = vmor %vm293_vm11, %vm303_vm12  ;;  %v298_v41 = vpop.permute.xlu1 %297 }
  0xa4   : > { %vm302_vm15 = vcmp.eq.s32.totalorder %v261_v36, %v298_v41  ;;  %v307_v42 = vsel %vm305_vm13, 1.0, %v685_v10 }
  0xa5   : > { %vm304_vm0 = vmor %vm292_vm14, %vm302_vm15 }
  0xa6   : > { %v306_v43 = vsel %vm304_vm0, 1.0, %v685_v10 }
  0xa7   : > { %v308_v44 = vpack.c.bf16 %v307_v42, %v306_v43  ;;  %v606_v45 = vpop.permute.xlu1 %605 }
  0xa8   : > { %v608_v46 = vunpack.i.h.bf16 %v606_v45  ;;  %v607_v47 = vunpack.i.l.bf16 %v606_v45 }
  0xa9   : > { %310 = vrot.lane.b32.xlu0 %v308_v44, %s690_s6  ;;  %s626_s6 = scalar_lea.vmem %s625_s5, 512 }
  0xaa   : > { %v248_v48 = vsel %vm247_vm1, %v225_v26, %v607_v47  ;;  %v249_v49 = vsel %vm247_vm1, %v224_v25, %v608_v46  ;;  %p628_p1 = scmp.lt.s32.totalorder %s626_s6, %s620_s30 }
  0xab   : > { %v611_v50 = vpop.permute.xlu1 %610 }
  0xac   : > { %v613_v51 = vunpack.i.h.bf16 %v611_v50  ;;  %v612_v52 = vunpack.i.l.bf16 %v611_v50  ;;  %p629_p2 = por %p628_p1, %p627_p0 }
  0xae   : > { %v251_v53 = vsel %vm250_vm2, %v248_v48, %v612_v52  ;;  %v252_v54 = vsel %vm250_vm2, %v249_v49, %v613_v51  ;;  %p630_p3 = pnand %p629_p2, %p623_p13 }
  0xaf   : > { %v253_v55 = vpack.c.bf16 %v252_v54, %v251_v53 }
  0xb1   : > { %v257_v57 = vsel %vm254_vm3, %v253_v55, 0 }
 0x11b   : > { %v311_v56 = vpop.permute.xlu0 %310 }
 0x11c   : > { %v314_v58 = vsel %vm312_vm4, %v257_v57, %v311_v56 }
 0x11d   : > { %546 = vmatmul.mubr.msk.bf16.vlgmr.msra.gmra.mxu0 %vm363_vm5, %v314_v58 }
 0x1dd   : > { %v400_v60 = vpop.f32.mrf.mxu0 }
 0x1de   : > { %v409_v61 = vadd.f32 %v407_v59, %v400_v60 }
 0x1df   : > { %v547_v62 = vpop.f32.mrf.mxu0 }
 0x1e0   : > { %412 = vst.msk [vmem:[%s205_s11] sm:$0xff] %vm411_vm6, %v409_v61 }
 0x1e1   : > { %v403_v0 = vpop.f32.mrf.mxu0 }
 0x1e2   : > { %v410_v1 = vadd.f32 %v408_v63, %v403_v0 }
 0x1e3   : > { %v548_v2 = vpop.f32.mrf.mxu0 }
 0x1e4   : > { %413 = vst.msk [vmem:[%s205_s11 + $0x8] sm:$0xff] %vm411_vm6, %v410_v1 }
 0x1e5   : > { %633 = shalt.err (!%p630_p3)
}
 0x1e6   : > { %s634_s7 = scalar_lea.hbm %s815_s28, 256  ;;  %s638_s10 = scalar_lea.hbm %s862_s4, 512 }
 0x1e7   : > { %p635_p4 = scmp.ne.s32.totalorder %s815_s28, %s634_s7  ;;  %p639_p9 = scmp.lt.s32.totalorder %s815_s28, %s862_s4 }
 0x1e8   : > { %p640_p10 = scmp.lt.s32.totalorder %s638_s10, %s634_s7 }
 0x1e9   : > { %p636_p7 = pnand %p635_p4, %p756_p5 }
 0x1ea   : > { %p641_p11 = por %p640_p10, %p639_p9 }
 0x1eb   : > { %p637_p8 = pneg %p636_p7 }
 0x1ed   : > { %p642_p12 = pnand %p641_p11, %p637_p8 }
 0x1ef   : > { %645 = shalt.err (!%p642_p12)
}
 0x1f0   : > { %s692_s14 = smov 128  }
 0x1f1   : > { %549 = dma.vmem_to_hbm [thread:$0]  (%p756_p5), %s810_s12, 256, %s815_s28, %s817_s29, %s692_s14, %s692_s14, %s688_s22  }
 0x1f2 PF: > { %p555_p13 = scmp.ge.s32.totalorder %s680_s18, 2  ;;  %s443_s20 = sand.u32 1, %s668_s15  }
 0x1f3   : > { %s444_s23 = scalar_lea.sflag [#allocation3], %s443_s20 }
 0x1f4   : > { %p552_p0 = pnand %p555_p13, %p760_p6 }
 0x1f6   : > { %p553_p1 = pneg %p552_p0 }
 0x1f8   : > { %663 = dma.done.wait (%p553_p1), %s444_s23, 256  }
 0x1f9   : > { %665 = vsyncadd (%p553_p1), %s444_s23, 4294967040  ;;  %p14_p2 = scmp.ge.s32.totalorder %s743_s21, 4   ;;  %s865_s15 = smov %s672_s16 }
 0x1fa   : > { %s866_s16 = smov %s676_s17  ;;  %s867_s17 = smov %s754_s24 }
 0x1fb   : > { %s868_s18 = smov %s743_s21  ;;  %16 = sbr.rel (!%p14_p2) target bundleno = 3 (0x3), region = 74 }
 0x200   :  { %449 = vsyncpa [#allocation3], 1 }
 0x201   :  { %451 = vsyncpa [#allocation3 + $0x1], 1 }

</bundles_post_ra>
